<compile_context>
chip_gen: v5e
topology: v5e:2x2
jax: 0.10.0
libtpu: 0.0.40
codegen_flags: <defaults>
</compile_context>

<pallas_src>
import functools

import jax
import jax.numpy as jnp
from jax import lax
from jax.experimental import pallas as pl
from jax.experimental.pallas import tpu as pltpu


def _mul_onehot_kernel(idx_ref, table_ref, out_ref, acc_ref):
    # idx_ref:   (tile_n, F)       int32    -- globally-offset feature indices
    # table_ref: (tile_v, D_pad)   bfloat16 -- one vocab block of the concat table
    # out_ref:   (tile_n, D_pad)   float32
    # acc_ref:   (tile_n, D_pad)   float32  -- accumulator across vocab blocks
    k = pl.program_id(1)

    @pl.when(k == 0)
    def _():
        acc_ref[...] = jnp.zeros_like(acc_ref)

    idx = idx_ref[...]
    _, num_feat = idx.shape
    tile_v = table_ref.shape[0]

    # Shift global indices into this vocab block's local range; indices outside
    # [0, tile_v) simply never match the iota below.
    local = idx - k * tile_v

    # Single-row iota: (1, tile_v).  The compare broadcasts it along sublanes
    # against (tile_n, 1) index columns, so no tile_n x tile_v int32 temporary
    # is ever materialized.
    iota = lax.broadcasted_iota(jnp.int32, (1, tile_v), 1)

    # Boolean OR accumulation (vocab ranges are disjoint); one bf16 cast at the
    # end instead of F float converts/adds over the (tile_n, tile_v) tile.
    # TODO(synk): for narrow D on v6e/v7x this multi-hot build is the VALU-bound
    # part; compare passes could be reduced further with int16 iota packing or
    # per-feature 128-aligned sub-range compares.
    hit = iota == local[:, 0:1]
    for ff in range(1, num_feat):          # F is small & static -> unrolled
        hit = hit | (iota == local[:, ff:ff + 1])
    mh = hit.astype(jnp.bfloat16)

    # bf16 x bf16 MXU matmul, f32 accumulation.
    acc_ref[...] += jnp.dot(mh, table_ref[...],
                            preferred_element_type=jnp.float32)

    @pl.when(k == pl.num_programs(1) - 1)
    def _():
        out_ref[...] = acc_ref[...]


@functools.partial(jax.jit,
                   static_argnames=("tile_n", "tile_v", "vmem_limit_bytes"))
def _mul_onehot_pallas(x_global, table_pad, *, tile_n, tile_v, vmem_limit_bytes):
    """x_global: [N_pad, F] int32 (globally-offset, N_pad % tile_n == 0);
    table_pad: [V_pad, D_pad] bf16, V_pad % tile_v == 0, D_pad % 128 == 0."""
    n_pad, f = x_global.shape
    v_pad, d_pad = table_pad.shape
    assert n_pad % tile_n == 0
    assert v_pad % tile_v == 0 and d_pad % 128 == 0

    n_tiles = n_pad // tile_n
    v_tiles = v_pad // tile_v

    cost = pl.CostEstimate(
        flops=2 * n_pad * v_pad * d_pad,
        transcendentals=0,
        bytes_accessed=(n_pad * f * 4                                   # indices
                        # resident table read once; streamed table re-read per row tile
                        + v_pad * d_pad * 2 * (1 if v_tiles == 1 else n_tiles)
                        + n_pad * d_pad * 4))                           # f32 output

    return pl.pallas_call(
        _mul_onehot_kernel,
        out_shape=jax.ShapeDtypeStruct((n_pad, d_pad), jnp.float32),
        grid_spec=pltpu.PrefetchScalarGridSpec(
            num_scalar_prefetch=0,
            grid=(n_tiles, v_tiles),
            in_specs=[
                pl.BlockSpec((tile_n, f), lambda i, k: (i, 0)),
                pl.BlockSpec((tile_v, d_pad), lambda i, k: (k, 0)),
            ],
            out_specs=pl.BlockSpec((tile_n, d_pad), lambda i, k: (i, 0)),
            scratch_shapes=[pltpu.VMEM((tile_n, d_pad), jnp.float32)],
        ),
        compiler_params=pltpu.CompilerParams(
            dimension_semantics=("parallel", "arbitrary"),  # rows shard over TCs
            vmem_limit_bytes=vmem_limit_bytes),
        cost_estimate=cost,
    )(x_global, table_pad)


def _round_up(x, m):
    return ((x + m - 1) // m) * m


def _chip_config():
    """Returns (tile_n, vmem_limit_bytes) per TPU generation."""
    kind = jax.devices()[0].device_kind.lower()
    if "v7" in kind or "7x" in kind:
        # v7x: 64 MiB physical VMEM per TC -> cap below physical for headroom.
        return 256, 48 * 1024 * 1024
    if "v5" in kind or "v6" in kind:
        # v5e / v6e: 128 MiB physical VMEM -> use most of it.
        return 512, 100 * 1024 * 1024
    # Unknown chip: conservative defaults.
    return 256, 48 * 1024 * 1024


def _choose_tile_v(v_pad_128, d_pad, tile_n, f, vmem_limit_bytes):
    """Largest vocab block (multiple of 128) that keeps the pipeline in VMEM."""
    # Fixed per-call costs: double-buffered index / output blocks + f32 acc.
    fixed = (2 * tile_n * f * 4
             + 2 * tile_n * d_pad * 4
             + tile_n * d_pad * 4)
    budget = int(vmem_limit_bytes * 0.7) - fixed
    # Per 128-row vocab slice: double-buffered bf16 table block plus an
    # allowance (~8 B/elem) for the multi-hot / mask temporaries.
    per_slice = 128 * (2 * d_pad * 2 + tile_n * 8)
    max_slices = max(1, budget // per_slice)
    return int(min(v_pad_128, max_slices * 128))


def mul_onehot_forward(x, tables):
    """Forward pass of MulOnehotEncoder.

    x: [N, F] int (x[:, i] indexes tables[i]); tables: list of [dim_i, D] f32.
    Returns [N, D] f32 (table operands in bf16 on the MXU, f32 accumulation).
    Note: out-of-range indices silently contribute zero rather than erroring
    like nn.Embedding.
    """
    n, f = x.shape
    d = tables[0].shape[1]
    feature_dims = [int(t.shape[0]) for t in tables]
    assert f == len(feature_dims)

    tile_n_cfg, vmem_limit = _chip_config()
    # Don't tile rows wider than the (row-padded) problem itself.
    tile_n = min(tile_n_cfg, _round_up(n, 128))

    # Static per-feature vocab offsets.
    offs = [0]
    for dim in feature_dims[:-1]:
        offs.append(offs[-1] + dim)
    offsets = jnp.array(offs, dtype=jnp.int32)

    # Concatenate tables, cast to bf16, pad: embed dim to a lane-dense multiple
    # of 128, vocab dim to a multiple of the chosen vocab block.
    table_cat = jnp.concatenate(tables, axis=0).astype(jnp.bfloat16)
    v_total = table_cat.shape[0]
    d_pad = _round_up(d, 128)
    tile_v = _choose_tile_v(_round_up(v_total, 128), d_pad, tile_n, f, vmem_limit)
    v_pad = _round_up(v_total, tile_v)
    table_pad = jnp.pad(table_cat, ((0, v_pad - v_total), (0, d_pad - d)))

    # Global (offset) indices; pad rows to a multiple of tile_n (padded rows
    # compute garbage that is sliced off below).
    x_global = x.astype(jnp.int32) + offsets[None, :]
    n_pad = _round_up(n, tile_n)
    if n_pad != n:
        x_global = jnp.pad(x_global, ((0, n_pad - n), (0, 0)))

    out = _mul_onehot_pallas(x_global, table_pad, tile_n=tile_n, tile_v=tile_v,
                             vmem_limit_bytes=vmem_limit)
    return out[:n, :d]


def xavier_uniform(key, shape):
    fan_in, fan_out = shape[0], shape[1]
    bound = jnp.sqrt(6.0 / (fan_in + fan_out))
    return jax.random.uniform(key, shape, jnp.float32, -bound, bound)


if __name__ == "__main__":
    key = jax.random.PRNGKey(0)

    # Small synthetic config (mirrors the nn.Embedding list in __init__).
    feature_dims = [13, 7, 9, 5]      # get_feature_dims()
    embed_dim = 32
    n_rows = 16

    # Deterministic parameter init (xavier_uniform per table, like the module).
    tables = []
    for dim in feature_dims:
        key, sub = jax.random.split(key)
        tables.append(xavier_uniform(sub, (dim, embed_dim)))

    # Deterministic integer inputs x[:, i] in [0, feature_dims[i]).
    cols = []
    for dim in feature_dims:
        key, sub = jax.random.split(key)
        cols.append(jax.random.randint(sub, (n_rows,), 0, dim, jnp.int32))
    x = jnp.stack(cols, axis=1)                       # [N, F] int32

    out = mul_onehot_forward(x, tables)
    out = jax.block_until_ready(out)

    # Pure-JAX reference (same semantics as the PyTorch forward); weights are
    # rounded to bf16 to match the kernel's MXU operand precision while the
    # accumulation stays in f32 — the comparison is exact up to f32 noise.
    tables_bf16 = [t.astype(jnp.bfloat16).astype(jnp.float32) for t in tables]
    ref = jnp.zeros((n_rows, embed_dim), jnp.float32)
    for i in range(len(feature_dims)):
        ref = ref + tables_bf16[i][x[:, i]]
    assert jnp.allclose(out, ref, atol=1e-5, rtol=1e-5)

    print("KERNEL_OK")
</pallas_src>

<mosaic_0001>
module attributes {stable_mosaic.version = 11 : i64} {
  func.func @_mul_onehot_kernel(%arg0: i32, %arg1: i32, %arg2: memref<128x4xi32, #tpu.memory_space<vmem>>, %arg3: memref<128x128xbf16, #tpu.memory_space<vmem>>, %arg4: memref<128x128xf32, #tpu.memory_space<vmem>>, %arg5: memref<128x128xf32, #tpu.memory_space<vmem>>) attributes {dimension_semantics = [#tpu.dimension_semantics<parallel>, #tpu.dimension_semantics<arbitrary>], iteration_bounds = array<i64: 1, 1>, scalar_prefetch = 0 : i64, scratch_operands = 1 : i64, tpu.core_type = #tpu.core_type<tc>, window_params = [{transform_indices = @transform_0, window_bounds = array<i64: 128, 4>}, {transform_indices = @transform_1, window_bounds = array<i64: 128, 128>}, {transform_indices = @transform_2, window_bounds = array<i64: 128, 128>}]} {
    %c0_i32 = arith.constant 0 : i32
    %0 = arith.cmpi eq, %arg1, %c0_i32 : i32
    %1 = arith.extui %0 : i1 to i32
    %c0_i32_0 = arith.constant 0 : i32
    %2 = arith.cmpi ne, %1, %c0_i32_0 : i32
    scf.if %2 {
      %cst_10 = arith.constant 0.000000e+00 : f32
      %38 = vector.broadcast %cst_10 : f32 to vector<128x128xf32>
      %c0_11 = arith.constant 0 : index
      %c0_12 = arith.constant 0 : index
      %39 = vector.load %arg5[%c0_11, %c0_12] : memref<128x128xf32, #tpu.memory_space<vmem>>, vector<128x128xf32>
      tpu.vector_store %arg5[%c0_11, %c0_12], %38 {strides = array<i32>} : memref<128x128xf32, #tpu.memory_space<vmem>>, vector<128x128xf32>,
    } else {
    }
    %c0 = arith.constant 0 : index
    %c0_1 = arith.constant 0 : index
    %3 = vector.load %arg2[%c0, %c0_1] : memref<128x4xi32, #tpu.memory_space<vmem>>, vector<128x4xi32>
    %c128_i32 = arith.constant 128 : i32
    %4 = arith.muli %arg1, %c128_i32 : i32
    %5 = vector.broadcast %4 : i32 to vector<128x4xi32>
    %6 = arith.subi %3, %5 : vector<128x4xi32>
    %7 = tpu.iota {dimensions = array<i32: 1>} : vector<1x128xi32>
    %8 = vector.extract_strided_slice %6 {offsets = [0, 0], sizes = [128, 1], strides = [1, 1]} : vector<128x4xi32> to vector<128x1xi32>
    %9 = vector.broadcast %7 : vector<1x128xi32> to vector<128x128xi32>
    %10 = vector.broadcast %8 : vector<128x1xi32> to vector<128x128xi32>
    %11 = arith.cmpi eq, %9, %10 : vector<128x128xi32>
    %12 = vector.extract_strided_slice %6 {offsets = [0, 1], sizes = [128, 1], strides = [1, 1]} : vector<128x4xi32> to vector<128x1xi32>
    %13 = vector.broadcast %7 : vector<1x128xi32> to vector<128x128xi32>
    %14 = vector.broadcast %12 : vector<128x1xi32> to vector<128x128xi32>
    %15 = arith.cmpi eq, %13, %14 : vector<128x128xi32>
    %16 = arith.ori %11, %15 : vector<128x128xi1>
    %17 = vector.extract_strided_slice %6 {offsets = [0, 2], sizes = [128, 1], strides = [1, 1]} : vector<128x4xi32> to vector<128x1xi32>
    %18 = vector.broadcast %7 : vector<1x128xi32> to vector<128x128xi32>
    %19 = vector.broadcast %17 : vector<128x1xi32> to vector<128x128xi32>
    %20 = arith.cmpi eq, %18, %19 : vector<128x128xi32>
    %21 = arith.ori %16, %20 : vector<128x128xi1>
    %22 = vector.extract_strided_slice %6 {offsets = [0, 3], sizes = [128, 1], strides = [1, 1]} : vector<128x4xi32> to vector<128x1xi32>
    %23 = vector.broadcast %7 : vector<1x128xi32> to vector<128x128xi32>
    %24 = vector.broadcast %22 : vector<128x1xi32> to vector<128x128xi32>
    %25 = arith.cmpi eq, %23, %24 : vector<128x128xi32>
    %26 = arith.ori %21, %25 : vector<128x128xi1>
    %27 = arith.extui %26 : vector<128x128xi1> to vector<128x128xi32>
    %28 = arith.sitofp %27 : vector<128x128xi32> to vector<128x128xf32>
    %29 = arith.truncf %28 : vector<128x128xf32> to vector<128x128xbf16>
    %c0_2 = arith.constant 0 : index
    %c0_3 = arith.constant 0 : index
    %30 = vector.load %arg5[%c0_2, %c0_3] : memref<128x128xf32, #tpu.memory_space<vmem>>, vector<128x128xf32>
    %c0_4 = arith.constant 0 : index
    %c0_5 = arith.constant 0 : index
    %31 = vector.load %arg3[%c0_4, %c0_5] : memref<128x128xbf16, #tpu.memory_space<vmem>>, vector<128x128xbf16>
    %cst = arith.constant dense<0.000000e+00> : vector<128x128xf32>
    %32 = tpu.matmul %29, %31, %cst {dimension_numbers = #tpu.dot_dimension_numbers<[1], [0], [0], [1], [0, 0, 1, 1], [], []>} : vector<128x128xbf16>, vector<128x128xbf16>, vector<128x128xf32> -> vector<128x128xf32>
    %33 = arith.addf %30, %32 : vector<128x128xf32>
    %c0_6 = arith.constant 0 : index
    %c0_7 = arith.constant 0 : index
    %34 = vector.load %arg5[%c0_6, %c0_7] : memref<128x128xf32, #tpu.memory_space<vmem>>, vector<128x128xf32>
    tpu.vector_store %arg5[%c0_6, %c0_7], %33 {strides = array<i32>} : memref<128x128xf32, #tpu.memory_space<vmem>>, vector<128x128xf32>,
    %c0_i32_8 = arith.constant 0 : i32
    %35 = arith.cmpi eq, %arg1, %c0_i32_8 : i32
    %36 = arith.extui %35 : i1 to i32
    %c0_i32_9 = arith.constant 0 : i32
    %37 = arith.cmpi ne, %36, %c0_i32_9 : i32
    scf.if %37 {
      %c0_10 = arith.constant 0 : index
      %c0_11 = arith.constant 0 : index
      %38 = vector.load %arg5[%c0_10, %c0_11] : memref<128x128xf32, #tpu.memory_space<vmem>>, vector<128x128xf32>
      %c0_12 = arith.constant 0 : index
      %c0_13 = arith.constant 0 : index
      %39 = vector.load %arg4[%c0_12, %c0_13] : memref<128x128xf32, #tpu.memory_space<vmem>>, vector<128x128xf32>
      tpu.vector_store %arg4[%c0_12, %c0_13], %38 {strides = array<i32>} : memref<128x128xf32, #tpu.memory_space<vmem>>, vector<128x128xf32>,
    } else {
    }
    return
  }
  func.func @transform_0(%arg0: i32, %arg1: i32) -> (i32, i32) {
    %c0_i32 = arith.constant 0 : i32
    %c0_i32_0 = arith.constant 0 : i32
    return %arg0, %c0_i32 : i32, i32
  }
  func.func @transform_1(%arg0: i32, %arg1: i32) -> (i32, i32) {
    %c0_i32 = arith.constant 0 : i32
    %c0_i32_0 = arith.constant 0 : i32
    return %arg1, %c0_i32 : i32, i32
  }
  func.func @transform_2(%arg0: i32, %arg1: i32) -> (i32, i32) {
    %c0_i32 = arith.constant 0 : i32
    %c0_i32_0 = arith.constant 0 : i32
    return %arg0, %c0_i32 : i32, i32
  }
}

</mosaic_0001>

<bundles_post_ra>
// kernel: _mul_onehot_pallas.1
= control target key start
LH: loop header
LB: loop body
LE: loop exit
PB: predicated region body
PF: predicated region fallthrough
CT: control target
= control target key end

     0   :  { %v781_v3 = vmov 0   ;;  %s1167_s0 = inlined_call_operand.vmem [shape: s32[128,4], index: 0, kind: input, shape index: {}]   ;;  %s1168_s1 = inlined_call_operand.vmem [shape: bf16[128,128], index: 1, kind: input, shape index: {}]   ;;  %s1169_s2 = inlined_call_operand.hbm [shape: f32[128,128], index: 2, kind: output, shape index: {}]  }
   0x1   :  { %v807_v0 = vld [vmem:[%s1167_s0 + $0x20] sm:$0xff]  ;;  %v812_v1 = vld [vmem:[%s1167_s0 + $0x10] sm:$0xff]  ;;  %732 = vset.pattern.permute.xlu2 %v781_v3  ;;  %731 = vset.pattern.permute.xlu1 %v781_v3 }
   0x2   :  { %v817_v2 = vld [vmem:[%s1167_s0] sm:$0xff]  ;;  %730 = vset.pattern.permute.xlu0 %v781_v3  ;;  %81 = vperm.xlu2 %732, %v807_v0  }
   0x3   :  { %75 = vperm.xlu1 %731, %v812_v1   ;;  %69 = vperm.xlu0 %730, %v817_v2  }
   0x4   :  { %7 = vsyncpa [#allocation4], 0  ;;  %v825_v4 = vld [vmem:[%s1167_s0 + $0x28] sm:$0xff]  ;;  %v830_v5 = vld [vmem:[%s1167_s0 + $0x18] sm:$0xff]  ;;  %v782_v17 = vmov 1   ;;  %v783_v18 = vmov 3   ;;  %v66_v29 = vlaneseq }
   0x5   :  { %v835_v6 = vld [vmem:[%s1167_s0 + $0x8] sm:$0xff]  ;;  %v40_v7 = vld [vmem:[%s1167_s0 + $0x40] sm:$0xff]  ;;  %v846_v8 = vld [vmem:[%s1167_s0 + $0x38] sm:$0xff]  ;;  %v784_v19 = vmov 2   ;;  %v1172_v38 = vmov 0  ;;  %v1174_v42 = vmov 0 }
   0x6   :  { %v851_v9 = vld [vmem:[%s1167_s0 + $0x30] sm:$0xff]  ;;  %v858_v10 = vld [vmem:[%s1167_s0 + $0x58] sm:$0xff]  ;;  %v41_v12 = vld [vmem:[%s1167_s0 + $0x48] sm:$0xff]  ;;  %v931_v30 = vand.u32 127, %v66_v29  ;;  %v1176_v46 = vmov 0  ;;  %v1178_v52 = vmov 0 }
   0x7   :  { %v863_v11 = vld [vmem:[%s1167_s0 + $0x50] sm:$0xff]  ;;  %v45_v14 = vld [vmem:[%s1167_s0 + $0x68] sm:$0xff]  ;;  %v44_v15 = vld [vmem:[%s1167_s0 + $0x60] sm:$0xff]  ;;  %v1180_v57 = vmov 0  ;;  %v1182_v59 = vmov 0  ;;  %s614_s3 = sshll.u32 %s1169_s2, 4  ;;  %s615_s3 = int_to_ptr.hbm [resolvable:$true] %s614_s3 }
   0x8   :  { %v873_v13 = vld [vmem:[%s1167_s0 + $0x70] sm:$0xff]  ;;  %v885_v16 = vld [vmem:[%s1167_s0 + $0x78] sm:$0xff]  ;;  %v695_v49 = vld [vmem:[%s1168_s1 + $0x28] sm:$0xff]  ;;  %s787_s4 = smov 128   ;;  %s788_s5 = smov 8  }
   0x9   :  { %v697_v44 = vld [vmem:[%s1168_s1 + $0x38] sm:$0xff]  ;;  %v696_v47 = vld [vmem:[%s1168_s1 + $0x30] sm:$0xff]  ;;  %v694_v53 = vld [vmem:[%s1168_s1 + $0x20] sm:$0xff] }
   0xa   :  { %84 = vperm.xlu2 %732, %v825_v4   ;;  %699 = vmatpush.bf16.msra.mxu2 %v697_v44  ;;  %v693_v55 = vld [vmem:[%s1168_s1 + $0x18] sm:$0xff]  ;;  %v692_v60 = vld [vmem:[%s1168_s1 + $0x10] sm:$0xff]  ;;  %v691_v62 = vld [vmem:[%s1168_s1 + $0x8] sm:$0xff] }
   0xb   :  { %78 = vperm.xlu1 %731, %v830_v5   ;;  %72 = vperm.xlu0 %730, %v835_v6   ;;  %v690_v3 = vld [vmem:[%s1168_s1] sm:$0xff]  ;;  %s786_s1 = smov [#allocation3]  }
   0xc   :  { %700 = vmatpush.bf16.msra.mxu3 %v697_v44  ;;  %492 = vmatpush.bf16.msra.mxu0 %v697_v44  ;;  %s612_s28 = sshll.u32 %s786_s1, 4  ;;  %s613_s28 = int_to_ptr.vmem [resolvable:$true] %s612_s28 }
   0xd   :  { %698 = vmatpush.bf16.msra.mxu1 %v697_v44 }
   0xe   :  { %702 = vmatpush.bf16.msra.mxu2 %v696_v47 }
  0x10   :  { %703 = vmatpush.bf16.msra.mxu3 %v696_v47  ;;  %493 = vmatpush.bf16.msra.mxu0 %v696_v47 }
  0x11   :  { %701 = vmatpush.bf16.msra.mxu1 %v696_v47 }
  0x12   :  { %93 = vperm.xlu2 %732, %v40_v7   ;;  %705 = vmatpush.bf16.msra.mxu2 %v695_v49 }
  0x13   :  { %90 = vperm.xlu1 %731, %v846_v8   ;;  %87 = vperm.xlu0 %730, %v851_v9  }
  0x14   :  { %706 = vmatpush.bf16.msra.mxu3 %v695_v49  ;;  %494 = vmatpush.bf16.msra.mxu0 %v695_v49 }
  0x15   :  { %704 = vmatpush.bf16.msra.mxu1 %v695_v49 }
  0x16   :  { %708 = vmatpush.bf16.msra.mxu2 %v694_v53 }
  0x18   :  { %709 = vmatpush.bf16.msra.mxu3 %v694_v53  ;;  %495 = vmatpush.bf16.msra.mxu0 %v694_v53 }
  0x19   :  { %707 = vmatpush.bf16.msra.mxu1 %v694_v53 }
  0x1a   :  { %102 = vperm.xlu2 %732, %v858_v10   ;;  %711 = vmatpush.bf16.msra.mxu2 %v693_v55 }
  0x1b   :  { %99 = vperm.xlu1 %731, %v863_v11   ;;  %96 = vperm.xlu0 %730, %v41_v12  }
  0x1c   :  { %712 = vmatpush.bf16.msra.mxu3 %v693_v55  ;;  %496 = vmatpush.bf16.msra.mxu0 %v693_v55 }
  0x1d   :  { %710 = vmatpush.bf16.msra.mxu1 %v693_v55 }
  0x1e   :  { %714 = vmatpush.bf16.msra.mxu2 %v692_v60 }
  0x20   :  { %715 = vmatpush.bf16.msra.mxu3 %v692_v60  ;;  %497 = vmatpush.bf16.msra.mxu0 %v692_v60 }
  0x21   :  { %713 = vmatpush.bf16.msra.mxu1 %v692_v60 }
  0x22   :  { %111 = vperm.xlu2 %732, %v873_v13   ;;  %717 = vmatpush.bf16.msra.mxu2 %v691_v62 }
  0x23   :  { %108 = vperm.xlu1 %731, %v45_v14   ;;  %105 = vperm.xlu0 %730, %v44_v15  }
  0x24   :  { %718 = vmatpush.bf16.msra.mxu3 %v691_v62  ;;  %498 = vmatpush.bf16.msra.mxu0 %v691_v62 }
  0x25   :  { %716 = vmatpush.bf16.msra.mxu1 %v691_v62 }
  0x26   :  { %720 = vmatpush.bf16.msra.mxu2 %v690_v3 }
  0x28   :  { %721 = vmatpush.bf16.msra.mxu3 %v690_v3  ;;  %499 = vmatpush.bf16.msra.mxu0 %v690_v3 }
  0x29   :  { %719 = vmatpush.bf16.msra.mxu1 %v690_v3 }
  0x2a   :  { %734 = vset.pattern.permute.xlu2 %v782_v17 }
  0x2b   :  { %733 = vset.pattern.permute.xlu1 %v782_v17  ;;  %114 = vperm.xlu0 %730, %v885_v16  }
  0x2c   :  { %136 = vperm.xlu2 %734, %v835_v6   ;;  %133 = vperm.xlu1 %733, %v817_v2  }
  0x33   :  { %739 = vset.pattern.permute.xlu0 %v783_v18 }
  0x34   :  { %145 = vperm.xlu2 %734, %v807_v0   ;;  %142 = vperm.xlu1 %733, %v830_v5  }
  0x35   :  { %329 = vperm.xlu0 %739, %v44_v15  }
  0x3c   :  { %151 = vperm.xlu2 %734, %v851_v9   ;;  %148 = vperm.xlu1 %733, %v825_v4  }
  0x3d   :  { %740 = vset.pattern.permute.xlu0 %v782_v17 }
  0x3e   :  { %139 = vperm.xlu0 %740, %v812_v1  }
  0x44   :  { %160 = vperm.xlu2 %734, %v41_v12   ;;  %157 = vperm.xlu1 %733, %v40_v7  }
  0x46   :  { %154 = vperm.xlu0 %740, %v846_v8  }
  0x4c   :  { %169 = vperm.xlu2 %734, %v44_v15   ;;  %166 = vperm.xlu1 %733, %v858_v10  }
  0x4e   :  { %163 = vperm.xlu0 %740, %v863_v11  }
  0x54   :  { %735 = vset.pattern.permute.xlu2 %v784_v19  ;;  %175 = vperm.xlu1 %733, %v873_v13  }
  0x55   :  { %237 = vperm.xlu2 %735, %v40_v7  }
  0x56   :  { %172 = vperm.xlu0 %740, %v45_v14  }
  0x5c   :  { %736 = vset.pattern.permute.xlu1 %v784_v19  ;;  %v82_v20 = vpop.permute.xlu2 %81 }
  0x5d   :  { %252 = vperm.xlu2 %735, %v45_v14   ;;  %249 = vperm.xlu1 %736, %v44_v15   ;;  %vm120_vm3 = vcmp.eq.s32.totalorder %v931_v30, %v82_v20  ;;  %v1192_v15 = vmov 0  ;;  %v785_v20 = vmov 1.0|1.0  }
  0x5e   :  { %178 = vperm.xlu0 %740, %v885_v16  }
  0x64   :  { %v903_v21 = vpop.permute.xlu2 %84 }
  0x65   :  { %738 = vset.pattern.permute.xlu2 %v783_v18  ;;  %737 = vset.pattern.permute.xlu1 %v783_v18  ;;  %vm121_vm15 = vcmp.eq.s32.totalorder %v931_v30, %v903_v21 }
  0x66   :  { %745 = vset.pattern.permute.xlu0 %v784_v19  ;;  %320 = vperm.xlu2 %738, %v41_v12  }
  0x67   :  { %317 = vperm.xlu1 %737, %v40_v7   ;;  %240 = vperm.xlu0 %745, %v41_v12   ;;  %v1186_v7 = vmov 0 }
  0x6c   :  { %v908_v22 = vpop.permute.xlu2 %93 }
  0x6e   :  { %741 = vset.pattern.permute.xlu2 %v784_v19 }
  0x6f   :  { %332 = vperm.xlu1 %737, %v45_v14   ;;  %228 = vperm.xlu0 %745, %v825_v4  }
  0x70   :  { %213 = vperm.xlu2 %741, %v817_v2  }
  0x74   :  { %v913_v23 = vpop.permute.xlu2 %102 }
  0x75   :  { %v915_v24 = vpop.permute.xlu1 %75  ;;  %v70_v25 = vpop.permute.xlu0 %69 }
  0x76   :  { %vm116_vm9 = vcmp.eq.s32.totalorder %v931_v30, %v70_v25 }
  0x77   :  { %742 = vset.pattern.permute.xlu1 %v784_v19  ;;  %222 = vperm.xlu0 %745, %v830_v5  }
  0x78   :  { %225 = vperm.xlu2 %741, %v807_v0   ;;  %216 = vperm.xlu1 %742, %v835_v6  }
  0x7c   :  { %v921_v26 = vpop.permute.xlu2 %111 }
  0x7d   :  { %v923_v27 = vpop.permute.xlu1 %78  ;;  %v73_v28 = vpop.permute.xlu0 %72 }
  0x7e   :  { %vm117_vm0 = vcmp.eq.s32.totalorder %v931_v30, %v73_v28  ;;  %vm119_vm13 = vcmp.eq.s32.totalorder %v931_v30, %v923_v27 }
  0x7f   :  { %751 = vset.pattern.permute.xlu0 %v783_v18 }
  0x80   :  { %744 = vset.pattern.permute.xlu2 %v783_v18  ;;  %743 = vset.pattern.permute.xlu1 %v783_v18 }
  0x81   :  { %296 = vperm.xlu2 %744, %v835_v6   ;;  %293 = vperm.xlu1 %743, %v817_v2   ;;  %v1184_v2 = vmov 0 }
  0x82   :  { %323 = vperm.xlu0 %751, %v863_v11  }
  0x85   :  { %v934_v31 = vpop.permute.xlu1 %90  ;;  %v88_v32 = vpop.permute.xlu0 %87 }
  0x86   :  { %v137_v33 = vpop.permute.xlu2 %136  ;;  %vm122_vm6 = vcmp.eq.s32.totalorder %v931_v30, %v88_v32 }
  0x87   :  { %vm181_vm1 = vcmp.eq.s32.totalorder %v931_v30, %v137_v33 }
  0x88   :  { %vm937_vm2 = vmor %vm117_vm0, %vm181_vm1 }
  0x89   :  { %308 = vperm.xlu2 %744, %v825_v4   ;;  %305 = vperm.xlu1 %743, %v807_v0  }
  0x8a   :  { %311 = vperm.xlu0 %751, %v851_v9  }
  0x8d   :  { %v944_v35 = vpop.permute.xlu1 %99  ;;  %v946_v36 = vpop.permute.xlu0 %96 }
  0x8e   :  { %v146_v37 = vpop.permute.xlu2 %145 }
  0x8f   :  { %vm184_vm4 = vcmp.eq.s32.totalorder %v931_v30, %v146_v37 }
  0x90   :  { %vm950_vm5 = vmor %vm120_vm3, %vm184_vm4  ;;  %vm118_vm3 = vcmp.eq.s32.totalorder %v931_v30, %v915_v24 }
  0x91   :  { %v1173_v38 = vsel %vm950_vm5, 4294967295, %v1172_v38  ;;  %747 = vset.pattern.permute.xlu2 %v784_v19  ;;  %746 = vset.pattern.permute.xlu1 %v784_v19 }
  0x92   :  { %246 = vperm.xlu2 %747, %v858_v10   ;;  %243 = vperm.xlu1 %746, %v863_v11   ;;  %v1190_v11 = vmov 0 }
  0x95   :  { %v959_v39 = vpop.permute.xlu1 %108  ;;  %v961_v40 = vpop.permute.xlu0 %105 }
  0x96   :  { %v152_v41 = vpop.permute.xlu2 %151 }
  0x97   :  { %vm186_vm7 = vcmp.eq.s32.totalorder %v931_v30, %v152_v41 }
  0x98   :  { %vm964_vm8 = vmor %vm122_vm6, %vm186_vm7  ;;  %vm123_vm7 = vcmp.eq.s32.totalorder %v931_v30, %v934_v31 }
  0x99   :  { %v1175_v42 = vsel %vm964_vm8, 4294967295, %v1174_v42 }
  0x9a   :  { %258 = vperm.xlu2 %747, %v885_v16   ;;  %255 = vperm.xlu1 %746, %v873_v13  }
  0x9d   :  { %v970_v43 = vpop.permute.xlu0 %114 }
  0x9e   :  { %v134_v45 = vpop.permute.xlu1 %133  ;;  %v984_v48 = vpop.permute.xlu2 %160 }
  0x9f   :  { %vm180_vm10 = vcmp.eq.s32.totalorder %v931_v30, %v134_v45  ;;  %vm189_vm8 = vcmp.eq.s32.totalorder %v931_v30, %v984_v48 }
  0xa0   :  { %vm977_vm11 = vmor %vm116_vm9, %vm180_vm10 }
  0xa1   :  { %v1177_v46 = vsel %vm977_vm11, 4294967295, %v1176_v46 }
  0xa2   :  { %749 = vset.pattern.permute.xlu2 %v783_v18  ;;  %748 = vset.pattern.permute.xlu1 %v783_v18 }
  0xa3   :  { %335 = vperm.xlu2 %749, %v873_v13   ;;  %326 = vperm.xlu1 %748, %v858_v10  }
  0xa6   :  { %v143_v50 = vpop.permute.xlu1 %142  ;;  %v1007_v54 = vpop.permute.xlu2 %169 }
  0xa7   :  { %vm183_vm12 = vcmp.eq.s32.totalorder %v931_v30, %v143_v50  ;;  %v994_v51 = vpop.permute.xlu0 %329 }
  0xa8   :  { %vm998_vm14 = vmor %vm119_vm13, %vm183_vm12  ;;  %vm127_vm12 = vcmp.eq.s32.totalorder %v931_v30, %v913_v23 }
  0xa9   :  { %v1179_v52 = vsel %vm998_vm14, 4294967295, %v1178_v52 }
  0xab   :  { %750 = vset.pattern.permute.xlu2 %v784_v19  ;;  %338 = vperm.xlu1 %748, %v885_v16  }
  0xac   :  { %219 = vperm.xlu2 %750, %v812_v1  }
  0xae   :  { %v149_v56 = vpop.permute.xlu1 %148 }
  0xaf   :  { %vm185_vm0 = vcmp.eq.s32.totalorder %v931_v30, %v149_v56  ;;  %v238_v61 = vpop.permute.xlu2 %237 }
  0xb0   :  { %vm1016_vm1 = vmor %vm121_vm15, %vm185_vm0  ;;  %v140_v58 = vpop.permute.xlu0 %139  ;;  %vm126_vm0 = vcmp.eq.s32.totalorder %v931_v30, %v944_v35 }
  0xb1   :  { %v1181_v57 = vsel %vm1016_vm1, 4294967295, %v1180_v57  ;;  %vm182_vm4 = vcmp.eq.s32.totalorder %v931_v30, %v140_v58 }
  0xb2   :  { %vm1023_vm6 = vmor %vm118_vm3, %vm182_vm4 }
  0xb3   :  { %v1183_v59 = vsel %vm1023_vm6, 4294967295, %v1182_v59  ;;  %752 = vset.pattern.permute.xlu1 %v784_v19  ;;  %vm268_vm6 = vcmp.eq.s32.totalorder %v931_v30, %v238_v61 }
  0xb4   :  { %234 = vperm.xlu2 %750, %v846_v8   ;;  %231 = vperm.xlu1 %752, %v851_v9  }
  0xb6   :  { %v158_v63 = vpop.permute.xlu1 %157 }
  0xb7   :  { %v253_v4 = vpop.permute.xlu2 %252 }
  0xb8   :  { %v155_v0 = vpop.permute.xlu0 %154 }
  0xb9   :  { %vm187_vm9 = vcmp.eq.s32.totalorder %v931_v30, %v155_v0 }
  0xba   :  { %vm1039_vm10 = vmor %vm123_vm7, %vm187_vm9  ;;  %vm130_vm7 = vcmp.eq.s32.totalorder %v931_v30, %v921_v26 }
  0xbb   :  { %v1185_v2 = vsel %vm1039_vm10, 4294967295, %v1184_v2 }
  0xbc   :  { %754 = vset.pattern.permute.xlu2 %v783_v18  ;;  %753 = vset.pattern.permute.xlu1 %v783_v18 }
  0xbd   :  { %302 = vperm.xlu2 %754, %v830_v5   ;;  %299 = vperm.xlu1 %753, %v812_v1   ;;  %v1188_v1 = vmov 0 }
  0xbe   :  { %v167_v6 = vpop.permute.xlu1 %166 }
  0xbf   :  { %vm191_vm13 = vcmp.eq.s32.totalorder %v931_v30, %v167_v6 }
  0xc0   :  { %vm1053_vm15 = vmor %vm127_vm12, %vm191_vm13  ;;  %v164_v9 = vpop.permute.xlu0 %163  ;;  %v321_v10 = vpop.permute.xlu2 %320 }
  0xc1   :  { %v1187_v7 = vsel %vm1053_vm15, 4294967295, %v1186_v7  ;;  %vm190_vm3 = vcmp.eq.s32.totalorder %v931_v30, %v164_v9 }
  0xc2   :  { %vm1060_vm4 = vmor %vm126_vm0, %vm190_vm3  ;;  %vm131_vm0 = vcmp.eq.s32.totalorder %v931_v30, %v970_v43  ;;  %vm188_vm3 = vcmp.eq.s32.totalorder %v931_v30, %v158_v63 }
  0xc3   :  { %v1189_v1 = vsel %vm1060_vm4, 4294967295, %v1188_v1 }
  0xc5   :  { %314 = vperm.xlu1 %753, %v846_v8  }
  0xc6   :  { %v176_v5 = vpop.permute.xlu1 %175 }
  0xc7   :  { %vm194_vm9 = vcmp.eq.s32.totalorder %v931_v30, %v176_v5 }
  0xc8   :  { %vm1068_vm12 = vmor %vm130_vm7, %vm194_vm9  ;;  %v173_v12 = vpop.permute.xlu0 %172  ;;  %vm124_vm7 = vcmp.eq.s32.totalorder %v931_v30, %v908_v22  ;;  %vm125_vm9 = vcmp.eq.s32.totalorder %v931_v30, %v946_v36 }
  0xc9   :  { %v1191_v11 = vsel %vm1068_vm12, 4294967295, %v1190_v11  ;;  %vm204_vm14 = vmor %vm124_vm7, %vm188_vm3  ;;  %vm193_vm12 = vcmp.eq.s32.totalorder %v931_v30, %v173_v12 }
  0xca   :  { %v214_v8 = vpop.permute.xlu2 %213  ;;  %vm205_vm15 = vmor %vm125_vm9, %vm189_vm8  ;;  %vm128_vm8 = vcmp.eq.s32.totalorder %v931_v30, %v961_v40  ;;  %vm273_vm9 = vcmp.eq.s32.totalorder %v931_v30, %v253_v4 }
  0xcf   :  { %v250_v13 = vpop.permute.xlu1 %249 }
  0xd0   :  { %v179_v14 = vpop.permute.xlu0 %178 }
  0xd1   :  { %vm195_vm13 = vcmp.eq.s32.totalorder %v931_v30, %v179_v14 }
  0xd2   :  { %vm1076_vm10 = vmor %vm131_vm0, %vm195_vm13  ;;  %vm129_vm13 = vcmp.eq.s32.totalorder %v931_v30, %v959_v39  ;;  %v226_v19 = vpop.permute.xlu2 %225 }
  0xd3   :  { %v1193_v15 = vsel %vm1076_vm10, 4294967295, %v1192_v15  ;;  %vm284_vm0 = vmor %vm204_vm14, %vm268_vm6  ;;  %vm349_vm10 = vcmp.eq.s32.totalorder %v931_v30, %v321_v10  ;;  %vm192_vm14 = vcmp.eq.s32.totalorder %v931_v30, %v1007_v54 }
  0xd4   :  { %vm1091_vm4 = vmor %vm129_vm13, %vm193_vm12  ;;  %vm272_vm13 = vcmp.eq.s32.totalorder %v931_v30, %v250_v13 }
  0xd5   :  { %vm208_vm11 = vmor %vm128_vm8, %vm192_vm14  ;;  %vm260_vm14 = vcmp.eq.s32.totalorder %v931_v30, %v214_v8 }
  0xd9   :  { %v318_v16 = vpop.permute.xlu1 %317  ;;  %v241_v17 = vpop.permute.xlu0 %240 }
  0xda   :  { %vm348_vm5 = vcmp.eq.s32.totalorder %v931_v30, %v318_v16  ;;  %vm269_vm1 = vcmp.eq.s32.totalorder %v931_v30, %v241_v17 }
  0xdb   :  { %vm364_vm3 = vmor %vm284_vm0, %vm348_vm5  ;;  %v297_v22 = vpop.permute.xlu2 %296 }
  0xdc   :  { %vm285_vm7 = vmor %vm205_vm15, %vm269_vm1  ;;  %vm352_vm1 = vcmp.eq.s32.totalorder %v931_v30, %v994_v51 }
  0xdd   :  { %vm365_vm6 = vmor %vm285_vm7, %vm349_vm10 }
  0xde   :  { %vm682_vm12 = vmpackc.low %vm365_vm6, %vm364_vm3  ;;  %vm1196_vm6 = vnez %v1177_v46 }
  0xdf   :  { %683 = vmatmul.msk.bf16.vlgmr.msra.gmra.mxu2 %vm682_vm12, %v785_v20  ;;  %vm289_vm5 = vmor %vm1091_vm4, %vm273_vm9  ;;  %vm341_vm4 = vcmp.eq.s32.totalorder %v931_v30, %v297_v22 }
  0xe0   :  { %vm288_vm15 = vmor %vm208_vm11, %vm272_vm13 }
  0xe1   :  { %v333_v21 = vpop.permute.xlu1 %332  ;;  %vm368_vm7 = vmor %vm288_vm15, %vm352_vm1  ;;  %v229_v25 = vpop.permute.xlu0 %228 }
  0xe2   :  { %vm353_vm0 = vcmp.eq.s32.totalorder %v931_v30, %v333_v21  ;;  %vm276_vm9 = vmor %vm1196_vm6, %vm260_vm14 }
  0xe3   :  { %vm369_vm10 = vmor %vm289_vm5, %vm353_vm0  ;;  %v309_v24 = vpop.permute.xlu2 %308  ;;  %vm265_vm5 = vcmp.eq.s32.totalorder %v931_v30, %v229_v25  ;;  %vm264_vm0 = vcmp.eq.s32.totalorder %v931_v30, %v226_v19 }
  0xe4   :  { %vm686_vm3 = vmpackc.low %vm369_vm10, %vm368_vm7  ;;  %vm1197_vm10 = vnez %v1181_v57 }
  0xe5   :  { %687 = vmatmul.msk.bf16.vlgmr.msra.gmra.mxu3 %vm686_vm3, %v785_v20  ;;  %vm281_vm7 = vmor %vm1197_vm10, %vm265_vm5  ;;  %vm1198_vm3 = vnez %v1173_v38 }
  0xe9   :  { %v223_v32 = vpop.permute.xlu0 %222 }
  0xea   :  { %v217_v23 = vpop.permute.xlu1 %216 }
  0xeb   :  { %vm261_vm8 = vcmp.eq.s32.totalorder %v931_v30, %v217_v23 }
  0xec   :  { %vm277_vm11 = vmor %vm937_vm2, %vm261_vm8  ;;  %vm345_vm2 = vcmp.eq.s32.totalorder %v931_v30, %v309_v24  ;;  %v247_v27 = vpop.permute.xlu2 %246 }
  0xed   :  { %vm357_vm1 = vmor %vm277_vm11, %vm341_vm4 }
  0xee   :  { %vm280_vm8 = vmor %vm1198_vm3, %vm264_vm0 }
  0xef   :  { %vm361_vm14 = vmor %vm281_vm7, %vm345_vm2 }
  0xf3   :  { %v294_v26 = vpop.permute.xlu1 %293 }
  0xf4   :  { %vm340_vm12 = vcmp.eq.s32.totalorder %v931_v30, %v294_v26  ;;  %v259_v29 = vpop.permute.xlu2 %258  ;;  %v324_v35 = vpop.permute.xlu0 %323 }
  0xf5   :  { %vm356_vm13 = vmor %vm276_vm9, %vm340_vm12  ;;  %vm271_vm12 = vcmp.eq.s32.totalorder %v931_v30, %v247_v27 }
  0xf6   :  { %vm674_vm15 = vmpackc.low %vm357_vm1, %vm356_vm13  ;;  %vm1199_vm13 = vnez %v1189_v1  ;;  %vm350_vm1 = vcmp.eq.s32.totalorder %v931_v30, %v324_v35 }
  0xf7   :  { %675 = vmatmul.msk.bf16.vlgmr.msra.gmra.mxu0 %vm674_vm15, %v785_v20  ;;  %vm1200_vm15 = vnez %v1187_v7 }
  0xf8   :  { %vm287_vm0 = vmor %vm1200_vm15, %vm271_vm12 }
  0xfb   :  { %v306_v28 = vpop.permute.xlu1 %305 }
  0xfc   :  { %vm344_vm6 = vcmp.eq.s32.totalorder %v931_v30, %v306_v28  ;;  %v312_v44 = vpop.permute.xlu0 %311 }
  0xfd   :  { %vm360_vm9 = vmor %vm280_vm8, %vm344_vm6  ;;  %v336_v33 = vpop.permute.xlu2 %335 }
  0xfe   :  { %vm678_vm4 = vmpackc.low %vm361_vm14, %vm360_vm9  ;;  %vm275_vm14 = vcmp.eq.s32.totalorder %v931_v30, %v259_v29  ;;  %vm354_vm6 = vcmp.eq.s32.totalorder %v931_v30, %v336_v33  ;;  %vm1201_vm9 = vnez %v1191_v11 }
  0xff   :  { %679 = vmatmul.msk.bf16.vlgmr.msra.gmra.mxu1 %vm678_vm4, %v785_v20 }
 0x104   :  { %v244_v31 = vpop.permute.xlu1 %243 }
 0x105   :  { %vm270_vm11 = vcmp.eq.s32.totalorder %v931_v30, %v244_v31 }
 0x106   :  { %vm286_vm5 = vmor %vm1199_vm13, %vm270_vm11  ;;  %v220_v37 = vpop.permute.xlu2 %219  ;;  %vm1202_vm11 = vnez %v1193_v15 }
 0x107   :  { %vm366_vm10 = vmor %vm286_vm5, %vm350_vm1 }
 0x108   :  { %vm291_vm12 = vmor %vm1202_vm11, %vm275_vm14 }
 0x10c   :  { %v256_v34 = vpop.permute.xlu1 %255 }
 0x10d   :  { %vm274_vm3 = vcmp.eq.s32.totalorder %v931_v30, %v256_v34 }
 0x10e   :  { %vm290_vm4 = vmor %vm1201_vm9, %vm274_vm3  ;;  %v235_v39 = vpop.permute.xlu2 %234 }
 0x10f   :  { %vm370_vm13 = vmor %vm290_vm4, %vm354_vm6 }
 0x115   :  { %v327_v36 = vpop.permute.xlu1 %326 }
 0x116   :  { %vm351_vm7 = vcmp.eq.s32.totalorder %v931_v30, %v327_v36 }
 0x117   :  { %vm367_vm2 = vmor %vm287_vm0, %vm351_vm7  ;;  %v303_v41 = vpop.permute.xlu2 %302  ;;  %vm263_vm0 = vcmp.eq.s32.totalorder %v931_v30, %v223_v32 }
 0x118   :  { %vm684_vm8 = vmpackc.low %vm367_vm2, %vm366_vm10  ;;  %vm262_vm10 = vcmp.eq.s32.totalorder %v931_v30, %v220_v37  ;;  %vm343_vm7 = vcmp.eq.s32.totalorder %v931_v30, %v303_v41  ;;  %vm1203_vm2 = vnez %v1179_v52 }
 0x119   :  { %685 = vmatmul.msk.bf16.gmra.mxu2 %vm684_vm8, %v785_v20  ;;  %vm279_vm3 = vmor %vm1203_vm2, %vm263_vm0  ;;  %vm1204_vm8 = vnez %v1183_v59  ;;  %vm1206_vm0 = vnez %v1185_v2 }
 0x11a   :  { %vm278_vm14 = vmor %vm1204_vm8, %vm262_vm10 }
 0x11b   :  { %vm359_vm6 = vmor %vm279_vm3, %vm343_vm7 }
 0x11d   :  { %v339_v38 = vpop.permute.xlu1 %338 }
 0x11e   :  { %vm355_vm5 = vcmp.eq.s32.totalorder %v931_v30, %v339_v38 }
 0x11f   :  { %vm371_vm1 = vmor %vm291_vm12, %vm355_vm5  ;;  %vm1205_vm5 = vnez %v1175_v42 }
 0x120   :  { %vm688_vm15 = vmpackc.low %vm371_vm1, %vm370_vm13  ;;  %vm267_vm13 = vcmp.eq.s32.totalorder %v931_v30, %v235_v39 }
 0x121   :  { %689 = vmatmul.msk.bf16.gmra.mxu3 %vm688_vm15, %v785_v20  ;;  %vm346_vm15 = vcmp.eq.s32.totalorder %v931_v30, %v312_v44  ;;  %vm283_vm10 = vmor %vm1206_vm0, %vm267_vm13 }
 0x126   :  { %v232_v40 = vpop.permute.xlu1 %231 }
 0x127   :  { %vm266_vm11 = vcmp.eq.s32.totalorder %v931_v30, %v232_v40 }
 0x128   :  { %vm282_vm1 = vmor %vm1205_vm5, %vm266_vm11 }
 0x129   :  { %vm362_vm7 = vmor %vm282_vm1, %vm346_vm15 }
 0x12f   :  { %v300_v43 = vpop.permute.xlu1 %299 }
 0x130   :  { %vm342_vm9 = vcmp.eq.s32.totalorder %v931_v30, %v300_v43 }
 0x131   :  { %vm358_vm4 = vmor %vm278_vm14, %vm342_vm9 }
 0x132   :  { %vm676_vm12 = vmpackc.low %vm359_vm6, %vm358_vm4 }
 0x133   :  { %677 = vmatmul.msk.bf16.gmra.mxu0 %vm676_vm12, %v785_v20 }
 0x137   :  { %v315_v45 = vpop.permute.xlu1 %314 }
 0x138   :  { %vm347_vm2 = vcmp.eq.s32.totalorder %v931_v30, %v315_v45 }
 0x139   :  { %vm363_vm3 = vmor %vm283_vm10, %vm347_vm2 }
 0x13a   :  { %vm680_vm8 = vmpackc.low %vm363_vm3, %vm362_vm7 }
 0x13b   :  { %681 = vmatmul.msk.bf16.gmra.mxu1 %vm680_vm8, %v785_v20 }
 0x162   :  { %v521_v46 = vpop.f32.mrf.mxu2 }
 0x163   :  { %600 = vst [vmem:[#allocation3 + $0x40] sm:$0xff] %v521_v46 }
 0x168   :  { %v531_v47 = vpop.f32.mrf.mxu3 }
 0x169   :  { %604 = vst [vmem:[#allocation3 + $0x60] sm:$0xff] %v531_v47 }
 0x16a   :  { %v523_v48 = vpop.f32.mrf.mxu2 }
 0x16b   :  { %601 = vst [vmem:[#allocation3 + $0x48] sm:$0xff] %v523_v48 }
 0x170   :  { %v533_v42 = vpop.f32.mrf.mxu3 }
 0x171   :  { %605 = vst [vmem:[#allocation3 + $0x68] sm:$0xff] %v533_v42 }
 0x174   :  { %v501_v49 = vpop.f32.mrf.mxu0 }
 0x175   :  { %592 = vst [vmem:[#allocation3] sm:$0xff] %v501_v49 }
 0x17c   :  { %v511_v50 = vpop.f32.mrf.mxu1  ;;  %v503_v51 = vpop.f32.mrf.mxu0 }
 0x17d   :  { %596 = vst [vmem:[#allocation3 + $0x20] sm:$0xff] %v511_v50 }
 0x17e   :  { %593 = vst [vmem:[#allocation3 + $0x8] sm:$0xff] %v503_v51 }
 0x184   :  { %v513_v52 = vpop.f32.mrf.mxu1 }
 0x185   :  { %597 = vst [vmem:[#allocation3 + $0x28] sm:$0xff] %v513_v52 }
 0x19c   :  { %v526_v30 = vpop.f32.mrf.mxu2 }
 0x19d   :  { %602 = vst [vmem:[#allocation3 + $0x50] sm:$0xff] %v526_v30 }
 0x1a4   :  { %v528_v53 = vpop.f32.mrf.mxu2  ;;  %v536_v54 = vpop.f32.mrf.mxu3 }
 0x1a5   :  { %603 = vst [vmem:[#allocation3 + $0x58] sm:$0xff] %v528_v53 }
 0x1a6   :  { %606 = vst [vmem:[#allocation3 + $0x70] sm:$0xff] %v536_v54 }
 0x1ac   :  { %v538_v55 = vpop.f32.mrf.mxu3 }
 0x1ad   :  { %607 = vst [vmem:[#allocation3 + $0x78] sm:$0xff] %v538_v55 }
 0x1b0   :  { %v506_v56 = vpop.f32.mrf.mxu0 }
 0x1b1   :  { %594 = vst [vmem:[#allocation3 + $0x10] sm:$0xff] %v506_v56 }
 0x1b8   :  { %v508_v57 = vpop.f32.mrf.mxu0  ;;  %v516_v58 = vpop.f32.mrf.mxu1 }
 0x1b9   :  { %595 = vst [vmem:[#allocation3 + $0x18] sm:$0xff] %v508_v57 }
 0x1ba   :  { %598 = vst [vmem:[#allocation3 + $0x30] sm:$0xff] %v516_v58 }
 0x1c0   :  { %v518_v59 = vpop.f32.mrf.mxu1 }
 0x1c1   :  { %599 = vst [vmem:[#allocation3 + $0x38] sm:$0xff] %v518_v59 }
 0x1c2   :  { %620 = dma.vmem_to_hbm [thread:$0]  %s613_s28, 2048, %s615_s3, [#allocation4], %s787_s4, %s787_s4, %s788_s5  }
 0x1c3   :  { %779 = dma.done.wait [#allocation4], 2048  }
 0x1c4   :  { %780 = vsyncadd [#allocation4], 4294965248 }
 0x1c5   :  { %625 = vsyncpa [#allocation4], 1 }

</bundles_post_ra>
